<compile_context>
chip_gen: v6e
topology: v6e:2x2x1
jax: 0.10.0
libtpu: 0.0.40
codegen_flags: <defaults>
</compile_context>

<pallas_src>
import functools

import jax
import jax.numpy as jnp
from jax import lax
from jax.experimental import pallas as pl
from jax.experimental.pallas import tpu as pltpu

LANES = 128
CHUNK_ROWS = 512                    # compute chunk: bounds in-kernel temps to ~2.5 MiB
MAX_TILE_ROWS_4B = 8192             # 4 MiB / input DMA block for f32
MAX_TILE_ROWS_2B = 16384            # 4 MiB / input DMA block for bf16
VMEM_LIMIT_BYTES = 40 * 1024 * 1024  # under v7x's 64 MiB physical VMEM


def _num_tensorcores() -> int:
    """2 on v7x (two TensorCores per chip), 1 on single-TC chips (v5e / v6e)."""
    try:
        kind = jax.devices()[0].device_kind.lower()
    except Exception:
        return 1
    return 2 if "7" in kind else 1


def _dice_bce_kernel(x_ref, t_ref, out_ref, *,
                     rows_total, block_rows, chunk_rows, blocks_per_core):
    c = pl.program_id(0)              # parallel slice (a TensorCore on v7x)
    i = pl.program_id(1)              # reduction step within the slice

    # out_ref (4, 8, 128) is the accumulator: its block index is constant along
    # the reduction axis, so it stays resident in VMEM across all i.
    @pl.when(i == 0)
    def _():
        out_ref[...] = jnp.zeros_like(out_ref)

    blk = c * blocks_per_core + i     # UNCLAMPED block index (index_map clamps the DMA)
    row_start = blk * block_rows
    n_chunks = block_rows // chunk_rows   # static, <= 16

    def chunk_partials(j, masked):
        """Partial sums of one (chunk_rows, 128) compute chunk, reduced to (8, 128)."""
        r0 = pl.multiple_of(j * chunk_rows, chunk_rows)
        x = x_ref[pl.ds(r0, chunk_rows), :].astype(jnp.float32)
        t = t_ref[pl.ds(r0, chunk_rows), :].astype(jnp.float32)

        # sigmoid and softplus share e = exp(-|x|) -> one EUP exp per element.
        e = jnp.exp(-jnp.abs(x))                       # in (0, 1]
        denom = 1.0 + e
        lg = jnp.log(denom)                            # log1p(exp(-|x|))
        p = jnp.where(x >= 0.0, 1.0, e) * pl.reciprocal(denom, approx=True)
        # Closed (logits) form of BCE; min(., 100) == torch's -100 log clamp.
        bce = (t * jnp.minimum(lg + jnp.maximum(-x, 0.0), 100.0)
               + (1.0 - t) * jnp.minimum(lg + jnp.maximum(x, 0.0), 100.0))
        pt = p * t

        if masked:
            # Only the ragged last block pays for the mask.  Stale-VMEM garbage in
            # the invalid rows is neutralized here (select does not propagate NaN).
            rid = lax.broadcasted_iota(jnp.int32, (chunk_rows, LANES), 0)
            valid = (row_start + r0 + rid) < rows_total
            pt = jnp.where(valid, pt, 0.0)
            p = jnp.where(valid, p, 0.0)
            t = jnp.where(valid, t, 0.0)
            bce = jnp.where(valid, bce, 0.0)

        def rsum(a):
            # (chunk_rows,128) -> (8,128): trailing (8,128) stays vreg-tiled, so this
            # is a pure VPU vreg-add tree (no cross-sublane XLU work in the hot loop).
            return jnp.sum(a.reshape(chunk_rows // 8, 8, LANES), axis=0)

        return rsum(pt), rsum(p), rsum(t), rsum(bce)

    def accumulate(masked):
        def body(j, carry):
            d0, d1, d2, d3 = chunk_partials(j, masked)
            return (carry[0] + d0, carry[1] + d1, carry[2] + d2, carry[3] + d3)

        zero = jnp.zeros((8, LANES), jnp.float32)
        s0, s1, s2, s3 = lax.fori_loop(0, n_chunks, body, (zero, zero, zero, zero),
                                       unroll=True)
        out_ref[0] += s0      # sum p*t
        out_ref[1] += s1      # sum p
        out_ref[2] += s2      # sum t
        out_ref[3] += s3      # sum bce

    fully_valid = row_start + block_rows <= rows_total
    in_range = row_start < rows_total

    @pl.when(fully_valid)
    def _():
        accumulate(masked=False)

    # Fully out-of-range duplicate blocks (from the nsplit rounding) skip all
    # compute; only the partial last block takes the masked path.
    @pl.when(jnp.logical_and(jnp.logical_not(fully_valid), in_range))
    def _():
        accumulate(masked=True)


def _partial_sums_jax(x, t):
    """[sum p*t, sum p, sum t, sum bce] of a small flat slice, in plain JAX."""
    xf = x.astype(jnp.float32)
    tf = t.astype(jnp.float32)
    p = jax.nn.sigmoid(xf)
    lg = jnp.log1p(jnp.exp(-jnp.abs(xf)))
    bce = (tf * jnp.minimum(lg + jnp.maximum(-xf, 0.0), 100.0)
           + (1.0 - tf) * jnp.minimum(lg + jnp.maximum(xf, 0.0), 100.0))
    return jnp.stack([jnp.sum(p * tf), jnp.sum(p), jnp.sum(tf), jnp.sum(bce)])


def _run_partial_sums_kernel(x2d, t2d):
    rows = int(x2d.shape[0])                # >= 8
    itemsize = max(jnp.dtype(x2d.dtype).itemsize, jnp.dtype(t2d.dtype).itemsize)
    max_tile_rows = MAX_TILE_ROWS_2B if itemsize <= 2 else MAX_TILE_ROWS_4B

    chunk_rows = min(CHUNK_ROWS, (rows // 8) * 8)                 # multiple of 8
    tile_rows = min(max_tile_rows, (rows // chunk_rows) * chunk_rows)
    total_blocks = pl.cdiv(rows, tile_rows)

    nsplit = min(_num_tensorcores(), total_blocks)
    bpc = pl.cdiv(total_blocks, nsplit)     # blocks per parallel slice

    # Clamp so duplicate / out-of-range grid steps re-read a valid block window;
    # their contribution is skipped in-kernel via the (unclamped) row_start gate.
    def in_map(c, i):
        return (jnp.minimum(c * bpc + i, total_blocks - 1), 0)

    kernel = functools.partial(
        _dice_bce_kernel,
        rows_total=rows,
        block_rows=int(tile_rows),
        chunk_rows=int(chunk_rows),
        blocks_per_core=int(bpc))

    # TODO(synk): if plain "parallel" does not actually shard the leading axis
    # across v7x's two TensorCores, switch it to pltpu.CORE_PARALLEL.
    lead_sem = "parallel" if nsplit > 1 else "arbitrary"

    part = pl.pallas_call(
        kernel,
        out_shape=jax.ShapeDtypeStruct((nsplit, 4, 8, LANES), jnp.float32),
        grid_spec=pltpu.PrefetchScalarGridSpec(
            num_scalar_prefetch=0,
            grid=(nsplit, bpc),
            in_specs=[
                pl.BlockSpec((tile_rows, LANES), in_map),
                pl.BlockSpec((tile_rows, LANES), in_map),
            ],
            out_specs=pl.BlockSpec((None, 4, 8, LANES), lambda c, i: (c, 0, 0, 0)),
        ),
        compiler_params=pltpu.CompilerParams(
            dimension_semantics=(lead_sem, "arbitrary"),
            vmem_limit_bytes=VMEM_LIMIT_BYTES),
    )(x2d, t2d)

    return jnp.sum(part, axis=(0, 2, 3))    # (4,): [sum p*t, sum p, sum t, sum bce]


def dice_bce_loss(inputs, targets, smooth=1.0):
    n = int(inputs.size)
    x = inputs.reshape(-1)
    t = targets.reshape(-1)

    n_pref = (n // LANES) * LANES      # 128-aligned prefix -> free (rows, 128) reshape
    rows = n_pref // LANES

    if rows < 8:
        # < 1024 elements: a kernel launch is not worth it.
        sums = _partial_sums_jax(x, t)
    else:
        if n_pref == n:
            xk, tk = x, t              # zero-copy: reshape of the contiguous flat array
            tail = None
        else:
            # TODO(synk): XLA may still materialize this prefix slice; a manual-DMA
            # (memory_space=pl.ANY) 1-D variant would make this path zero-copy too.
            xk, tk = x[:n_pref], t[:n_pref]
            tail = (x[n_pref:], t[n_pref:])
        sums = _run_partial_sums_kernel(xk.reshape(rows, LANES),
                                        tk.reshape(rows, LANES))
        if tail is not None:
            sums = sums + _partial_sums_jax(*tail)

    intersection, sum_p, sum_t, bce_sum = sums[0], sums[1], sums[2], sums[3]
    bce = bce_sum / n
    dice_loss = 1.0 - (2.0 * intersection + smooth) / (sum_p + sum_t + smooth)
    return bce + dice_loss


def _reference(inputs, targets, smooth=1.0):
    p = jax.nn.sigmoid(inputs.reshape(-1).astype(jnp.float32))
    t = targets.reshape(-1).astype(jnp.float32)
    intersection = jnp.sum(p * t)
    dice = 1.0 - (2.0 * intersection + smooth) / (jnp.sum(p) + jnp.sum(t) + smooth)
    bce = jnp.mean(-(t * jnp.maximum(jnp.log(p), -100.0)
                     + (1.0 - t) * jnp.maximum(jnp.log(1.0 - p), -100.0)))
    return bce + dice


if __name__ == "__main__":
    key = jax.random.PRNGKey(0)
    k1, k2, k3, k4 = jax.random.split(key, 4)

    # Segmentation-style logit/target pair (NCHW); numel % 128 == 0 -> zero-copy path.
    x = jax.random.normal(k1, (2, 4, 16, 16), dtype=jnp.float32)
    tgt = (jax.random.uniform(k2, (2, 4, 16, 16)) > 0.5).astype(jnp.float32)
    loss = jax.block_until_ready(dice_bce_loss(x, tgt, smooth=1.0))
    ref = jax.block_until_ready(_reference(x, tgt, smooth=1.0))
    # pl.reciprocal(approx=True) in the sigmoid perturbs only the dice term at a
    # small (<~1e-3) level; the BCE term is exact fp32.  Hence the loose tolerance.
    assert jnp.allclose(loss, ref, atol=5e-3, rtol=5e-3), (loss, ref)

    # Ragged size (numel % 128 != 0) -> 128-aligned prefix kernel + plain-JAX tail,
    # exercising the masked partial last block.
    x2 = jax.random.normal(k3, (3, 5, 7, 11), dtype=jnp.float32)
    t2 = (jax.random.uniform(k4, (3, 5, 7, 11)) > 0.5).astype(jnp.float32)
    loss2 = jax.block_until_ready(dice_bce_loss(x2, t2, smooth=1.0))
    ref2 = jax.block_until_ready(_reference(x2, t2, smooth=1.0))
    assert jnp.allclose(loss2, ref2, atol=5e-3, rtol=5e-3), (loss2, ref2)

    print("KERNEL_OK")
</pallas_src>

<mosaic_0001>
module attributes {stable_mosaic.version = 11 : i64} {
  func.func @_dice_bce_kernel(%arg0: i32, %arg1: i32, %arg2: memref<16x128xf32, #tpu.memory_space<vmem>>, %arg3: memref<16x128xf32, #tpu.memory_space<vmem>>, %arg4: memref<1x4x8x128xf32, #tpu.memory_space<vmem>>) attributes {dimension_semantics = [#tpu.dimension_semantics<arbitrary>, #tpu.dimension_semantics<arbitrary>], iteration_bounds = array<i64: 1, 1>, scalar_prefetch = 0 : i64, scratch_operands = 0 : i64, tpu.core_type = #tpu.core_type<tc>, window_params = [{transform_indices = @transform_0, window_bounds = array<i64: 16, 128>}, {transform_indices = @transform_1, window_bounds = array<i64: 16, 128>}, {transform_indices = @transform_2, window_bounds = array<i64: 1, 4, 8, 128>}]} {
    %c0_i32 = arith.constant 0 : i32
    %0 = arith.cmpi eq, %arg1, %c0_i32 : i32
    %1 = arith.extui %0 : i1 to i32
    %c0_i32_0 = arith.constant 0 : i32
    %2 = arith.cmpi ne, %1, %c0_i32_0 : i32
    scf.if %2 {
      %cst = arith.constant 0.000000e+00 : f32
      %15 = vector.broadcast %cst : f32 to vector<4x8x128xf32>
      %c0 = arith.constant 0 : index
      %c0_6 = arith.constant 0 : index
      %c0_7 = arith.constant 0 : index
      %c0_8 = arith.constant 0 : index
      %16 = vector.load %arg4[%c0, %c0_6, %c0_7, %c0_8] : memref<1x4x8x128xf32, #tpu.memory_space<vmem>>, vector<1x4x8x128xf32>
      %17 = vector.shape_cast %16 : vector<1x4x8x128xf32> to vector<4x8x128xf32>
      %18 = vector.shape_cast %15 : vector<4x8x128xf32> to vector<1x4x8x128xf32>
      tpu.vector_store %arg4[%c0, %c0_6, %c0_7, %c0_8], %18 {strides = array<i32>} : memref<1x4x8x128xf32, #tpu.memory_space<vmem>>, vector<1x4x8x128xf32>,
    } else {
    }
    %c1_i32 = arith.constant 1 : i32
    %3 = arith.muli %arg0, %c1_i32 : i32
    %4 = arith.addi %3, %arg1 : i32
    %c16_i32 = arith.constant 16 : i32
    %5 = arith.muli %4, %c16_i32 : i32
    %c16_i32_1 = arith.constant 16 : i32
    %6 = arith.addi %5, %c16_i32_1 : i32
    %c16_i32_2 = arith.constant 16 : i32
    %7 = arith.cmpi sle, %6, %c16_i32_2 : i32
    %c16_i32_3 = arith.constant 16 : i32
    %8 = arith.cmpi slt, %5, %c16_i32_3 : i32
    %9 = arith.extui %7 : i1 to i32
    %c0_i32_4 = arith.constant 0 : i32
    %10 = arith.cmpi ne, %9, %c0_i32_4 : i32
    scf.if %10 {
      %cst = arith.constant 0.000000e+00 : f32
      %15 = vector.broadcast %cst : f32 to vector<8x128xf32>
      %c0_i32_6 = arith.constant 0 : i32
      %c16_i32_7 = arith.constant 16 : i32
      %16 = arith.muli %c0_i32_6, %c16_i32_7 : i32
      %17 = tpu.assume_multiple %16, 16 : i32
      %18 = arith.index_cast %17 : i32 to index
      %c0 = arith.constant 0 : index
      %19 = vector.load %arg2[%18, %c0] : memref<16x128xf32, #tpu.memory_space<vmem>>, vector<16x128xf32>
      %20 = arith.index_cast %17 : i32 to index
      %c0_8 = arith.constant 0 : index
      %21 = vector.load %arg3[%20, %c0_8] : memref<16x128xf32, #tpu.memory_space<vmem>>, vector<16x128xf32>
      %22 = math.absf %19 : vector<16x128xf32>
      %cst_9 = arith.constant 0.000000e+00 : f32
      %23 = vector.broadcast %cst_9 : f32 to vector<16x128xf32>
      %24 = arith.subf %23, %22 : vector<16x128xf32>
      %25 = math.exp %24 : vector<16x128xf32>
      %cst_10 = arith.constant 1.000000e+00 : f32
      %26 = vector.broadcast %cst_10 : f32 to vector<16x128xf32>
      %27 = arith.addf %26, %25 : vector<16x128xf32>
      %28 = math.log %27 : vector<16x128xf32>
      %cst_11 = arith.constant 0.000000e+00 : f32
      %29 = vector.broadcast %cst_11 : f32 to vector<16x128xf32>
      %30 = arith.cmpf oge, %19, %29 : vector<16x128xf32>
      %cst_12 = arith.constant 1.000000e+00 : f32
      %31 = vector.broadcast %cst_12 : f32 to vector<16x128xf32>
      %32 = arith.select %30, %31, %25 : vector<16x128xi1>, vector<16x128xf32>
      %33 = tpu.reciprocal %27 {approx = true} : vector<16x128xf32> -> vector<16x128xf32>
      %34 = arith.mulf %32, %33 : vector<16x128xf32>
      %cst_13 = arith.constant 0.000000e+00 : f32
      %35 = vector.broadcast %cst_13 : f32 to vector<16x128xf32>
      %36 = arith.subf %35, %19 : vector<16x128xf32>
      %cst_14 = arith.constant 0.000000e+00 : f32
      %37 = vector.broadcast %cst_14 : f32 to vector<16x128xf32>
      %38 = arith.maximumf %36, %37 : vector<16x128xf32>
      %39 = arith.addf %28, %38 : vector<16x128xf32>
      %cst_15 = arith.constant 1.000000e+02 : f32
      %40 = vector.broadcast %cst_15 : f32 to vector<16x128xf32>
      %41 = arith.minimumf %39, %40 : vector<16x128xf32>
      %42 = arith.mulf %21, %41 : vector<16x128xf32>
      %cst_16 = arith.constant 1.000000e+00 : f32
      %43 = vector.broadcast %cst_16 : f32 to vector<16x128xf32>
      %44 = arith.subf %43, %21 : vector<16x128xf32>
      %cst_17 = arith.constant 0.000000e+00 : f32
      %45 = vector.broadcast %cst_17 : f32 to vector<16x128xf32>
      %46 = arith.maximumf %19, %45 : vector<16x128xf32>
      %47 = arith.addf %28, %46 : vector<16x128xf32>
      %cst_18 = arith.constant 1.000000e+02 : f32
      %48 = vector.broadcast %cst_18 : f32 to vector<16x128xf32>
      %49 = arith.minimumf %47, %48 : vector<16x128xf32>
      %50 = arith.mulf %44, %49 : vector<16x128xf32>
      %51 = arith.addf %42, %50 : vector<16x128xf32>
      %52 = arith.mulf %34, %21 : vector<16x128xf32>
      %53 = vector.shape_cast %52 : vector<16x128xf32> to vector<2x8x128xf32>
      %cst_19 = arith.constant dense<0.000000e+00> : vector<8x128xf32>
      %54 = vector.multi_reduction <add>, %53, %cst_19 [0] : vector<2x8x128xf32> to vector<8x128xf32>
      %55 = vector.shape_cast %34 : vector<16x128xf32> to vector<2x8x128xf32>
      %cst_20 = arith.constant dense<0.000000e+00> : vector<8x128xf32>
      %56 = vector.multi_reduction <add>, %55, %cst_20 [0] : vector<2x8x128xf32> to vector<8x128xf32>
      %57 = vector.shape_cast %21 : vector<16x128xf32> to vector<2x8x128xf32>
      %cst_21 = arith.constant dense<0.000000e+00> : vector<8x128xf32>
      %58 = vector.multi_reduction <add>, %57, %cst_21 [0] : vector<2x8x128xf32> to vector<8x128xf32>
      %59 = vector.shape_cast %51 : vector<16x128xf32> to vector<2x8x128xf32>
      %cst_22 = arith.constant dense<0.000000e+00> : vector<8x128xf32>
      %60 = vector.multi_reduction <add>, %59, %cst_22 [0] : vector<2x8x128xf32> to vector<8x128xf32>
      %61 = arith.addf %15, %54 : vector<8x128xf32>
      %62 = arith.addf %15, %56 : vector<8x128xf32>
      %63 = arith.addf %15, %58 : vector<8x128xf32>
      %64 = arith.addf %15, %60 : vector<8x128xf32>
      %c1_i32_23 = arith.constant 1 : i32
      %c0_24 = arith.constant 0 : index
      %c0_25 = arith.constant 0 : index
      %c0_26 = arith.constant 0 : index
      %c0_27 = arith.constant 0 : index
      %65 = vector.load %arg4[%c0_24, %c0_25, %c0_26, %c0_27] : memref<1x4x8x128xf32, #tpu.memory_space<vmem>>, vector<1x1x8x128xf32>
      %66 = vector.shape_cast %65 : vector<1x1x8x128xf32> to vector<8x128xf32>
      %67 = arith.addf %66, %61 : vector<8x128xf32>
      %c0_28 = arith.constant 0 : index
      %c0_29 = arith.constant 0 : index
      %c0_30 = arith.constant 0 : index
      %c0_31 = arith.constant 0 : index
      %68 = vector.load %arg4[%c0_28, %c0_29, %c0_30, %c0_31] : memref<1x4x8x128xf32, #tpu.memory_space<vmem>>, vector<1x1x8x128xf32>
      %69 = vector.shape_cast %68 : vector<1x1x8x128xf32> to vector<8x128xf32>
      %70 = vector.shape_cast %67 : vector<8x128xf32> to vector<1x1x8x128xf32>
      tpu.vector_store %arg4[%c0_28, %c0_29, %c0_30, %c0_31], %70 {strides = array<i32>} : memref<1x4x8x128xf32, #tpu.memory_space<vmem>>, vector<1x1x8x128xf32>,
      %c0_32 = arith.constant 0 : index
      %c1 = arith.constant 1 : index
      %c0_33 = arith.constant 0 : index
      %c0_34 = arith.constant 0 : index
      %71 = vector.load %arg4[%c0_32, %c1, %c0_33, %c0_34] : memref<1x4x8x128xf32, #tpu.memory_space<vmem>>, vector<1x1x8x128xf32>
      %72 = vector.shape_cast %71 : vector<1x1x8x128xf32> to vector<8x128xf32>
      %73 = arith.addf %72, %62 : vector<8x128xf32>
      %c0_35 = arith.constant 0 : index
      %c1_36 = arith.constant 1 : index
      %c0_37 = arith.constant 0 : index
      %c0_38 = arith.constant 0 : index
      %74 = vector.load %arg4[%c0_35, %c1_36, %c0_37, %c0_38] : memref<1x4x8x128xf32, #tpu.memory_space<vmem>>, vector<1x1x8x128xf32>
      %75 = vector.shape_cast %74 : vector<1x1x8x128xf32> to vector<8x128xf32>
      %76 = vector.shape_cast %73 : vector<8x128xf32> to vector<1x1x8x128xf32>
      tpu.vector_store %arg4[%c0_35, %c1_36, %c0_37, %c0_38], %76 {strides = array<i32>} : memref<1x4x8x128xf32, #tpu.memory_space<vmem>>, vector<1x1x8x128xf32>,
      %c0_39 = arith.constant 0 : index
      %c2 = arith.constant 2 : index
      %c0_40 = arith.constant 0 : index
      %c0_41 = arith.constant 0 : index
      %77 = vector.load %arg4[%c0_39, %c2, %c0_40, %c0_41] : memref<1x4x8x128xf32, #tpu.memory_space<vmem>>, vector<1x1x8x128xf32>
      %78 = vector.shape_cast %77 : vector<1x1x8x128xf32> to vector<8x128xf32>
      %79 = arith.addf %78, %63 : vector<8x128xf32>
      %c0_42 = arith.constant 0 : index
      %c2_43 = arith.constant 2 : index
      %c0_44 = arith.constant 0 : index
      %c0_45 = arith.constant 0 : index
      %80 = vector.load %arg4[%c0_42, %c2_43, %c0_44, %c0_45] : memref<1x4x8x128xf32, #tpu.memory_space<vmem>>, vector<1x1x8x128xf32>
      %81 = vector.shape_cast %80 : vector<1x1x8x128xf32> to vector<8x128xf32>
      %82 = vector.shape_cast %79 : vector<8x128xf32> to vector<1x1x8x128xf32>
      tpu.vector_store %arg4[%c0_42, %c2_43, %c0_44, %c0_45], %82 {strides = array<i32>} : memref<1x4x8x128xf32, #tpu.memory_space<vmem>>, vector<1x1x8x128xf32>,
      %c0_46 = arith.constant 0 : index
      %c3 = arith.constant 3 : index
      %c0_47 = arith.constant 0 : index
      %c0_48 = arith.constant 0 : index
      %83 = vector.load %arg4[%c0_46, %c3, %c0_47, %c0_48] : memref<1x4x8x128xf32, #tpu.memory_space<vmem>>, vector<1x1x8x128xf32>
      %84 = vector.shape_cast %83 : vector<1x1x8x128xf32> to vector<8x128xf32>
      %85 = arith.addf %84, %64 : vector<8x128xf32>
      %c0_49 = arith.constant 0 : index
      %c3_50 = arith.constant 3 : index
      %c0_51 = arith.constant 0 : index
      %c0_52 = arith.constant 0 : index
      %86 = vector.load %arg4[%c0_49, %c3_50, %c0_51, %c0_52] : memref<1x4x8x128xf32, #tpu.memory_space<vmem>>, vector<1x1x8x128xf32>
      %87 = vector.shape_cast %86 : vector<1x1x8x128xf32> to vector<8x128xf32>
      %88 = vector.shape_cast %85 : vector<8x128xf32> to vector<1x1x8x128xf32>
      tpu.vector_store %arg4[%c0_49, %c3_50, %c0_51, %c0_52], %88 {strides = array<i32>} : memref<1x4x8x128xf32, #tpu.memory_space<vmem>>, vector<1x1x8x128xf32>,
    } else {
    }
    %true = arith.constant true
    %11 = arith.xori %7, %true : i1
    %12 = arith.andi %11, %8 : i1
    %13 = arith.extui %12 : i1 to i32
    %c0_i32_5 = arith.constant 0 : i32
    %14 = arith.cmpi ne, %13, %c0_i32_5 : i32
    scf.if %14 {
      %cst = arith.constant 0.000000e+00 : f32
      %15 = vector.broadcast %cst : f32 to vector<8x128xf32>
      %c0_i32_6 = arith.constant 0 : i32
      %c16_i32_7 = arith.constant 16 : i32
      %16 = arith.muli %c0_i32_6, %c16_i32_7 : i32
      %17 = tpu.assume_multiple %16, 16 : i32
      %18 = arith.index_cast %17 : i32 to index
      %c0 = arith.constant 0 : index
      %19 = vector.load %arg2[%18, %c0] : memref<16x128xf32, #tpu.memory_space<vmem>>, vector<16x128xf32>
      %20 = arith.index_cast %17 : i32 to index
      %c0_8 = arith.constant 0 : index
      %21 = vector.load %arg3[%20, %c0_8] : memref<16x128xf32, #tpu.memory_space<vmem>>, vector<16x128xf32>
      %22 = math.absf %19 : vector<16x128xf32>
      %cst_9 = arith.constant 0.000000e+00 : f32
      %23 = vector.broadcast %cst_9 : f32 to vector<16x128xf32>
      %24 = arith.subf %23, %22 : vector<16x128xf32>
      %25 = math.exp %24 : vector<16x128xf32>
      %cst_10 = arith.constant 1.000000e+00 : f32
      %26 = vector.broadcast %cst_10 : f32 to vector<16x128xf32>
      %27 = arith.addf %26, %25 : vector<16x128xf32>
      %28 = math.log %27 : vector<16x128xf32>
      %cst_11 = arith.constant 0.000000e+00 : f32
      %29 = vector.broadcast %cst_11 : f32 to vector<16x128xf32>
      %30 = arith.cmpf oge, %19, %29 : vector<16x128xf32>
      %cst_12 = arith.constant 1.000000e+00 : f32
      %31 = vector.broadcast %cst_12 : f32 to vector<16x128xf32>
      %32 = arith.select %30, %31, %25 : vector<16x128xi1>, vector<16x128xf32>
      %33 = tpu.reciprocal %27 {approx = true} : vector<16x128xf32> -> vector<16x128xf32>
      %34 = arith.mulf %32, %33 : vector<16x128xf32>
      %cst_13 = arith.constant 0.000000e+00 : f32
      %35 = vector.broadcast %cst_13 : f32 to vector<16x128xf32>
      %36 = arith.subf %35, %19 : vector<16x128xf32>
      %cst_14 = arith.constant 0.000000e+00 : f32
      %37 = vector.broadcast %cst_14 : f32 to vector<16x128xf32>
      %38 = arith.maximumf %36, %37 : vector<16x128xf32>
      %39 = arith.addf %28, %38 : vector<16x128xf32>
      %cst_15 = arith.constant 1.000000e+02 : f32
      %40 = vector.broadcast %cst_15 : f32 to vector<16x128xf32>
      %41 = arith.minimumf %39, %40 : vector<16x128xf32>
      %42 = arith.mulf %21, %41 : vector<16x128xf32>
      %cst_16 = arith.constant 1.000000e+00 : f32
      %43 = vector.broadcast %cst_16 : f32 to vector<16x128xf32>
      %44 = arith.subf %43, %21 : vector<16x128xf32>
      %cst_17 = arith.constant 0.000000e+00 : f32
      %45 = vector.broadcast %cst_17 : f32 to vector<16x128xf32>
      %46 = arith.maximumf %19, %45 : vector<16x128xf32>
      %47 = arith.addf %28, %46 : vector<16x128xf32>
      %cst_18 = arith.constant 1.000000e+02 : f32
      %48 = vector.broadcast %cst_18 : f32 to vector<16x128xf32>
      %49 = arith.minimumf %47, %48 : vector<16x128xf32>
      %50 = arith.mulf %44, %49 : vector<16x128xf32>
      %51 = arith.addf %42, %50 : vector<16x128xf32>
      %52 = arith.mulf %34, %21 : vector<16x128xf32>
      %53 = tpu.iota {dimensions = array<i32: 0>} : vector<16x128xi32>
      %54 = arith.addi %5, %17 : i32
      %55 = vector.broadcast %54 : i32 to vector<16x128xi32>
      %56 = arith.addi %55, %53 : vector<16x128xi32>
      %c16_i32_19 = arith.constant 16 : i32
      %57 = vector.broadcast %c16_i32_19 : i32 to vector<16x128xi32>
      %58 = arith.cmpi slt, %56, %57 : vector<16x128xi32>
      %cst_20 = arith.constant 0.000000e+00 : f32
      %59 = vector.broadcast %cst_20 : f32 to vector<16x128xf32>
      %60 = arith.select %58, %52, %59 : vector<16x128xi1>, vector<16x128xf32>
      %cst_21 = arith.constant 0.000000e+00 : f32
      %61 = vector.broadcast %cst_21 : f32 to vector<16x128xf32>
      %62 = arith.select %58, %34, %61 : vector<16x128xi1>, vector<16x128xf32>
      %cst_22 = arith.constant 0.000000e+00 : f32
      %63 = vector.broadcast %cst_22 : f32 to vector<16x128xf32>
      %64 = arith.select %58, %21, %63 : vector<16x128xi1>, vector<16x128xf32>
      %cst_23 = arith.constant 0.000000e+00 : f32
      %65 = vector.broadcast %cst_23 : f32 to vector<16x128xf32>
      %66 = arith.select %58, %51, %65 : vector<16x128xi1>, vector<16x128xf32>
      %67 = vector.shape_cast %60 : vector<16x128xf32> to vector<2x8x128xf32>
      %cst_24 = arith.constant dense<0.000000e+00> : vector<8x128xf32>
      %68 = vector.multi_reduction <add>, %67, %cst_24 [0] : vector<2x8x128xf32> to vector<8x128xf32>
      %69 = vector.shape_cast %62 : vector<16x128xf32> to vector<2x8x128xf32>
      %cst_25 = arith.constant dense<0.000000e+00> : vector<8x128xf32>
      %70 = vector.multi_reduction <add>, %69, %cst_25 [0] : vector<2x8x128xf32> to vector<8x128xf32>
      %71 = vector.shape_cast %64 : vector<16x128xf32> to vector<2x8x128xf32>
      %cst_26 = arith.constant dense<0.000000e+00> : vector<8x128xf32>
      %72 = vector.multi_reduction <add>, %71, %cst_26 [0] : vector<2x8x128xf32> to vector<8x128xf32>
      %73 = vector.shape_cast %66 : vector<16x128xf32> to vector<2x8x128xf32>
      %cst_27 = arith.constant dense<0.000000e+00> : vector<8x128xf32>
      %74 = vector.multi_reduction <add>, %73, %cst_27 [0] : vector<2x8x128xf32> to vector<8x128xf32>
      %75 = arith.addf %15, %68 : vector<8x128xf32>
      %76 = arith.addf %15, %70 : vector<8x128xf32>
      %77 = arith.addf %15, %72 : vector<8x128xf32>
      %78 = arith.addf %15, %74 : vector<8x128xf32>
      %c1_i32_28 = arith.constant 1 : i32
      %c0_29 = arith.constant 0 : index
      %c0_30 = arith.constant 0 : index
      %c0_31 = arith.constant 0 : index
      %c0_32 = arith.constant 0 : index
      %79 = vector.load %arg4[%c0_29, %c0_30, %c0_31, %c0_32] : memref<1x4x8x128xf32, #tpu.memory_space<vmem>>, vector<1x1x8x128xf32>
      %80 = vector.shape_cast %79 : vector<1x1x8x128xf32> to vector<8x128xf32>
      %81 = arith.addf %80, %75 : vector<8x128xf32>
      %c0_33 = arith.constant 0 : index
      %c0_34 = arith.constant 0 : index
      %c0_35 = arith.constant 0 : index
      %c0_36 = arith.constant 0 : index
      %82 = vector.load %arg4[%c0_33, %c0_34, %c0_35, %c0_36] : memref<1x4x8x128xf32, #tpu.memory_space<vmem>>, vector<1x1x8x128xf32>
      %83 = vector.shape_cast %82 : vector<1x1x8x128xf32> to vector<8x128xf32>
      %84 = vector.shape_cast %81 : vector<8x128xf32> to vector<1x1x8x128xf32>
      tpu.vector_store %arg4[%c0_33, %c0_34, %c0_35, %c0_36], %84 {strides = array<i32>} : memref<1x4x8x128xf32, #tpu.memory_space<vmem>>, vector<1x1x8x128xf32>,
      %c0_37 = arith.constant 0 : index
      %c1 = arith.constant 1 : index
      %c0_38 = arith.constant 0 : index
      %c0_39 = arith.constant 0 : index
      %85 = vector.load %arg4[%c0_37, %c1, %c0_38, %c0_39] : memref<1x4x8x128xf32, #tpu.memory_space<vmem>>, vector<1x1x8x128xf32>
      %86 = vector.shape_cast %85 : vector<1x1x8x128xf32> to vector<8x128xf32>
      %87 = arith.addf %86, %76 : vector<8x128xf32>
      %c0_40 = arith.constant 0 : index
      %c1_41 = arith.constant 1 : index
      %c0_42 = arith.constant 0 : index
      %c0_43 = arith.constant 0 : index
      %88 = vector.load %arg4[%c0_40, %c1_41, %c0_42, %c0_43] : memref<1x4x8x128xf32, #tpu.memory_space<vmem>>, vector<1x1x8x128xf32>
      %89 = vector.shape_cast %88 : vector<1x1x8x128xf32> to vector<8x128xf32>
      %90 = vector.shape_cast %87 : vector<8x128xf32> to vector<1x1x8x128xf32>
      tpu.vector_store %arg4[%c0_40, %c1_41, %c0_42, %c0_43], %90 {strides = array<i32>} : memref<1x4x8x128xf32, #tpu.memory_space<vmem>>, vector<1x1x8x128xf32>,
      %c0_44 = arith.constant 0 : index
      %c2 = arith.constant 2 : index
      %c0_45 = arith.constant 0 : index
      %c0_46 = arith.constant 0 : index
      %91 = vector.load %arg4[%c0_44, %c2, %c0_45, %c0_46] : memref<1x4x8x128xf32, #tpu.memory_space<vmem>>, vector<1x1x8x128xf32>
      %92 = vector.shape_cast %91 : vector<1x1x8x128xf32> to vector<8x128xf32>
      %93 = arith.addf %92, %77 : vector<8x128xf32>
      %c0_47 = arith.constant 0 : index
      %c2_48 = arith.constant 2 : index
      %c0_49 = arith.constant 0 : index
      %c0_50 = arith.constant 0 : index
      %94 = vector.load %arg4[%c0_47, %c2_48, %c0_49, %c0_50] : memref<1x4x8x128xf32, #tpu.memory_space<vmem>>, vector<1x1x8x128xf32>
      %95 = vector.shape_cast %94 : vector<1x1x8x128xf32> to vector<8x128xf32>
      %96 = vector.shape_cast %93 : vector<8x128xf32> to vector<1x1x8x128xf32>
      tpu.vector_store %arg4[%c0_47, %c2_48, %c0_49, %c0_50], %96 {strides = array<i32>} : memref<1x4x8x128xf32, #tpu.memory_space<vmem>>, vector<1x1x8x128xf32>,
      %c0_51 = arith.constant 0 : index
      %c3 = arith.constant 3 : index
      %c0_52 = arith.constant 0 : index
      %c0_53 = arith.constant 0 : index
      %97 = vector.load %arg4[%c0_51, %c3, %c0_52, %c0_53] : memref<1x4x8x128xf32, #tpu.memory_space<vmem>>, vector<1x1x8x128xf32>
      %98 = vector.shape_cast %97 : vector<1x1x8x128xf32> to vector<8x128xf32>
      %99 = arith.addf %98, %78 : vector<8x128xf32>
      %c0_54 = arith.constant 0 : index
      %c3_55 = arith.constant 3 : index
      %c0_56 = arith.constant 0 : index
      %c0_57 = arith.constant 0 : index
      %100 = vector.load %arg4[%c0_54, %c3_55, %c0_56, %c0_57] : memref<1x4x8x128xf32, #tpu.memory_space<vmem>>, vector<1x1x8x128xf32>
      %101 = vector.shape_cast %100 : vector<1x1x8x128xf32> to vector<8x128xf32>
      %102 = vector.shape_cast %99 : vector<8x128xf32> to vector<1x1x8x128xf32>
      tpu.vector_store %arg4[%c0_54, %c3_55, %c0_56, %c0_57], %102 {strides = array<i32>} : memref<1x4x8x128xf32, #tpu.memory_space<vmem>>, vector<1x1x8x128xf32>,
    } else {
    }
    return
  }
  func.func @transform_0(%arg0: i32, %arg1: i32) -> (i32, i32) {
    %c1_i32 = arith.constant 1 : i32
    %0 = arith.muli %arg0, %c1_i32 : i32
    %1 = arith.addi %0, %arg1 : i32
    %c0_i32 = arith.constant 0 : i32
    %2 = arith.minsi %1, %c0_i32 : i32
    %c0_i32_0 = arith.constant 0 : i32
    %c0_i32_1 = arith.constant 0 : i32
    return %2, %c0_i32_0 : i32, i32
  }
  func.func @transform_1(%arg0: i32, %arg1: i32) -> (i32, i32) {
    %c1_i32 = arith.constant 1 : i32
    %0 = arith.muli %arg0, %c1_i32 : i32
    %1 = arith.addi %0, %arg1 : i32
    %c0_i32 = arith.constant 0 : i32
    %2 = arith.minsi %1, %c0_i32 : i32
    %c0_i32_0 = arith.constant 0 : i32
    %c0_i32_1 = arith.constant 0 : i32
    return %2, %c0_i32_0 : i32, i32
  }
  func.func @transform_2(%arg0: i32, %arg1: i32) -> (i32, i32, i32, i32) {
    %c0_i32 = arith.constant 0 : i32
    %c0_i32_0 = arith.constant 0 : i32
    %c0_i32_1 = arith.constant 0 : i32
    %c0_i32_2 = arith.constant 0 : i32
    return %arg0, %c0_i32, %c0_i32_0, %c0_i32_1 : i32, i32, i32, i32
  }
}

</mosaic_0001>

<bundles_post_ra>
// kernel: tpu_custom_call.1
= control target key start
LH: loop header
LB: loop body
LE: loop exit
PB: predicated region body
PF: predicated region fallthrough
CT: control target
= control target key end

     0   :  { %7 = vsyncpa [#allocation3], 0  ;;  %s388_s0 = inlined_call_operand.hbm [shape: f32[16,128], index: 0, kind: input, shape index: {}]   ;;  %s389_s1 = inlined_call_operand.hbm [shape: f32[16,128], index: 1, kind: input, shape index: {}]   ;;  %s390_s2 = inlined_call_operand.hbm [shape: f32[1,4,8,128], index: 2, kind: output, shape index: {}]  }
   0x1   :  { %8 = vsyncpa [#allocation6], 0 }
   0x2   :  { %9 = vsyncpa [#allocation4], 0  ;;  %s350_s9 = smov [#allocation2]  }
   0x3   :  { %s21_s10 = sshll.u32 %s350_s9, 4  ;;  %s22_s10 = int_to_ptr.vmem [resolvable:$true] %s21_s10 }
   0x4   :  { %s292_s11 = scalar_lea.vmem %s22_s10, 256  ;;  %p297_p1 = scmp.lt.s32.totalorder %s22_s10, %s22_s10 }
   0x5   :  { %p293_p0 = scmp.ne.s32.totalorder %s22_s10, %s292_s11  ;;  %p298_p2 = scmp.lt.s32.totalorder %s292_s11, %s292_s11 }
   0x7   :  { %p299_p3 = por %p298_p2, %p297_p1 }
   0x9   :  { %p300_p4 = pnand %p299_p3, %p293_p0 }
   0xb   :  { %303 = shalt.err (!%p300_p4)
}
   0xc   :  { %s351_s12 = smov 128   ;;  %s352_s13 = smov 8  }
   0xd   :  { %27 = dma.hbm_to_vmem [thread:$0]  %s388_s0, 256, %s22_s10, [#allocation3], %s351_s12, %s351_s12, %s352_s13  }
   0xe   :  { %s353_s16 = smov [#allocation5]  }
   0xf   :  { %s39_s17 = sshll.u32 %s353_s16, 4  ;;  %s40_s17 = int_to_ptr.vmem [resolvable:$true] %s39_s17 }
  0x10   :  { %s312_s18 = scalar_lea.vmem %s40_s17, 256  ;;  %p317_p6 = scmp.lt.s32.totalorder %s40_s17, %s40_s17 }
  0x11   :  { %p313_p5 = scmp.ne.s32.totalorder %s40_s17, %s312_s18  ;;  %p318_p7 = scmp.lt.s32.totalorder %s312_s18, %s312_s18 }
  0x13   :  { %p319_p8 = por %p318_p7, %p317_p6 }
  0x15   :  { %p320_p9 = pnand %p319_p8, %p313_p5 }
  0x17   :  { %323 = shalt.err (!%p320_p9)
}
  0x18   :  { %45 = dma.hbm_to_vmem [thread:$0]  %s389_s1, 256, %s40_s17, [#allocation6], %s351_s12, %s351_s12, %s352_s13  }
  0x19   :  { %344 = dma.done.wait [#allocation3], 256  }
  0x1a   :  { %345 = vsyncadd [#allocation3], 4294967040 }
  0x1b   :  { %346 = dma.done.wait [#allocation6], 256  }
  0x1c   :  { %347 = vsyncadd [#allocation6], 4294967040  ;;  %v76_v0 = vld [vmem:[#allocation2] sm:$0xff]  ;;  %v77_v1 = vld [vmem:[#allocation2 + $0x8] sm:$0xff]  ;;  %s354_s0 = smov [#allocation7]  }
  0x1d   :  { %v78_v2 = vld [vmem:[#allocation5] sm:$0xff]  ;;  %v79_v3 = vld [vmem:[#allocation5 + $0x8] sm:$0xff]  ;;  %v80_v4 = vand.u32 2147483647, %v76_v0  ;;  %v81_v5 = vand.u32 2147483647, %v77_v1 }
  0x1e   :  { %v128_v6 = vadd.f32 %v79_v3, %v78_v2  ;;  %vm94_vm0 = vcmp.ge.f32.partialorder %v76_v0, 0.0  ;;  %vm95_vm1 = vcmp.ge.f32.partialorder %v77_v1, 0.0  ;;  %v102_v15 = vsub.f32 0.0, %v76_v0  ;;  %s249_s1 = sshll.u32 %s354_s0, 4  ;;  %s250_s1 = int_to_ptr.vmem [resolvable:$true] %s249_s1 }
  0x1f   :  { %v82_v7 = vsub.f32 0.0, %v80_v4  ;;  %v83_v8 = vsub.f32 0.0, %v81_v5  ;;  %v103_v17 = vsub.f32 0.0, %v77_v1  ;;  %v114_v23 = vmax.f32 %v76_v0, 0.0  ;;  %s324_s21 = scalar_lea.vmem %s250_s1, 512  ;;  %p329_p11 = scmp.lt.s32.totalorder %s250_s1, %s250_s1 }
  0x20   :  { %144 = vst [vmem:[#allocation7 + $0x10] sm:$0xff] %v128_v6  ;;  %v104_v22 = vmax.f32 %v102_v15, 0.0  ;;  %v115_v27 = vmax.f32 %v77_v1, 0.0  ;;  %v112_v35 = vsub.f32 1.0, %v78_v2  ;;  %v113_v36 = vsub.f32 1.0, %v79_v3  ;;  %p325_p10 = scmp.ne.s32.totalorder %s250_s1, %s324_s21  ;;  %p330_p12 = scmp.lt.s32.totalorder %s324_s21, %s324_s21 }
  0x21   :  { %v84_v9 = vmul.f32 1.442695, %v82_v7  ;;  %v86_v10 = vmul.f32 1.442695, %v83_v8  ;;  %v105_v26 = vmax.f32 %v103_v17, 0.0 }
  0x22   :  { %p331_p13 = por %p330_p12, %p329_p11 }
  0x23   :  { %272 = vpow2.f32 %v84_v9 }
  0x24   :  { %274 = vpow2.f32 %v86_v10  ;;  %p332_p0 = pnand %p331_p13, %p325_p10 }
  0x30   :  { %v273_v11 = vpop.eup %272 }
  0x31   :  { %v275_v12 = vpop.eup %274  ;;  %v88_v13 = vadd.f32 1.0, %v273_v11  ;;  %v96_v16 = vsel %vm94_vm0, 1.0, %v273_v11 }
  0x32   :  { %v89_v14 = vadd.f32 1.0, %v275_v12  ;;  %v97_v18 = vsel %vm95_vm1, 1.0, %v275_v12 }
  0x33   :  { %276 = vrcp.f32 %v88_v13 }
  0x34   :  { %278 = vrcp.f32 %v89_v14 }
  0x35   :  { %280 = vlog2.f32 %v88_v13 }
  0x36   :  { %282 = vlog2.f32 %v89_v14 }
  0x40   :  { %v277_v19 = vpop.eup %276 }
  0x41   :  { %v279_v20 = vpop.eup %278  ;;  %v100_v21 = vmul.f32 %v277_v19, %v96_v16 }
  0x42   :  { %v281_v24 = vpop.eup %280  ;;  %v101_v25 = vmul.f32 %v279_v20, %v97_v18 }
  0x43   :  { %v283_v28 = vpop.eup %282  ;;  %v124_v29 = vmul.f32 %v100_v21, %v78_v2  ;;  %v91_v30 = vmul.f32 0.6931472, %v281_v24 }
  0x44   :  { %v125_v31 = vmul.f32 %v101_v25, %v79_v3  ;;  %v127_v32 = vadd.f32 %v101_v25, %v100_v21  ;;  %v93_v33 = vmul.f32 0.6931472, %v283_v28 }
  0x45   :  { %v106_v34 = vadd.f32 %v104_v22, %v91_v30  ;;  %v116_v37 = vadd.f32 %v114_v23, %v91_v30 }
  0x46   :  { %v126_v38 = vadd.f32 %v125_v31, %v124_v29  ;;  %v107_v39 = vadd.f32 %v105_v26, %v93_v33  ;;  %v117_v40 = vadd.f32 %v115_v27, %v93_v33  ;;  %140 = vst [vmem:[#allocation7 + $0x8] sm:$0xff] %v127_v32 }
  0x47   :  { %v108_v41 = vmin.f32 %v106_v34, 100.0  ;;  %v118_v42 = vmin.f32 %v116_v37, 100.0 }
  0x48   :  { %v109_v43 = vmin.f32 %v107_v39, 100.0  ;;  %v119_v44 = vmin.f32 %v117_v40, 100.0  ;;  %136 = vst [vmem:[#allocation7] sm:$0xff] %v126_v38 }
  0x49   :  { %v110_v45 = vmul.f32 %v108_v41, %v78_v2  ;;  %v120_v46 = vmul.f32 %v118_v42, %v112_v35 }
  0x4a   :  { %v111_v47 = vmul.f32 %v109_v43, %v79_v3  ;;  %v121_v48 = vmul.f32 %v119_v44, %v113_v36 }
  0x4b   :  { %v122_v49 = vadd.f32 %v120_v46, %v110_v45 }
  0x4c   :  { %v123_v50 = vadd.f32 %v121_v48, %v111_v47 }
  0x4e   :  { %v129_v51 = vadd.f32 %v123_v50, %v122_v49 }
  0x50   :  { %148 = vst [vmem:[#allocation7 + $0x18] sm:$0xff] %v129_v51 }
  0x51   :  { %335 = shalt.err (!%p332_p0)
}
  0x52   :  { %255 = dma.vmem_to_hbm [thread:$0]  %s250_s1, 512, %s390_s2, [#allocation4], %s351_s12, %s351_s12, %s352_s13  }
  0x53   :  { %348 = dma.done.wait [#allocation4], 512  }
  0x54   :  { %349 = vsyncadd [#allocation4], 4294966784 }
  0x55   :  { %259 = vsyncpa [#allocation3], 1 }
  0x56   :  { %260 = vsyncpa [#allocation6], 1 }
  0x57   :  { %261 = vsyncpa [#allocation4], 1 }

</bundles_post_ra>
